<compile_context>
chip_gen: v6e
topology: v6e:2x2x1
jax: 0.10.0
libtpu: 0.0.40
codegen_flags: <defaults>
</compile_context>

<pallas_src>
import math
import numpy as np
import jax
import jax.numpy as jnp
from jax.experimental import pallas as pl
from jax.experimental.pallas import tpu as pltpu

EPS = 1e-4
NEG_BIG = -1e30


def _make_ncod_kernel(num_real_classes):
    """Kernel factory; `num_real_classes` masks the lane-padded class columns."""

    def kernel(logits_ref, lbl_ref, phi_ref, hcT_ref, u_ref, out_ref):
        logits = logits_ref[...]                 # (TB, Cp) f32, pad cols = NEG_BIG
        lbl = lbl_ref[...]                       # (TB, 1)  i32
        u = u_ref[...]                           # (TB, 1)  f32
        Cp = logits.shape[1]

        col = jax.lax.broadcasted_iota(jnp.int32, logits.shape, 1)
        y = (col == lbl).astype(jnp.float32)     # one-hot rows, zero on padding

        # --- cosine similarity: raw bf16 MXU matmul, L2-normalization folded in
        #     afterwards (cos = (phi @ hcT) / max(||phi||, eps), identical math) ---
        phi = phi_ref[...]                       # (TB, D) bf16
        raw = jax.lax.dot_general(
            phi, hcT_ref[...], (((1,), (0,)), ((), ())),
            preferred_element_type=jnp.float32)  # (TB, Cp) f32
        phi_f = phi.astype(jnp.float32)
        sumsq = jnp.sum(phi_f * phi_f, axis=1, keepdims=True)          # (TB, 1)
        inv_norm = jax.lax.rsqrt(jnp.maximum(sumsq, EPS * EPS))        # EUP
        # only the true-class column survives the one-hot mask; relu commutes
        # with the positive scale.
        cos_true = jnp.maximum(
            jnp.sum(raw * y, axis=1, keepdims=True) * inv_norm, 0.0)   # (TB, 1)

        # --- softmax prob of the true class (exact denominator) ---
        mx = jnp.max(logits, axis=1, keepdims=True)
        e = jnp.exp(logits - mx)                 # padded columns underflow to 0
        den = jnp.sum(e, axis=1, keepdims=True)
        sm_true = jnp.sum(e * y, axis=1, keepdims=True) / den
        fxs_true = jnp.clip(sm_true + u, EPS, 1.0)
        l1_rows = -cos_true * jnp.log(fxs_true)                        # (TB, 1)

        # --- y_hat = one_hot(argmax(logits)), first max wins; padded lanes are
        #     NEG_BIG and additionally excluded from the max mask ---
        is_max = (logits == mx) & (col < num_real_classes)
        first = jnp.min(jnp.where(is_max, col, Cp), axis=1, keepdims=True)
        y_hat = (col == first).astype(jnp.float32)

        # --- L2 rows: sum((y_hat + u*y - y)^2); zero on padded columns ---
        diff = y_hat + u * y - y
        l2_rows = jnp.sum(diff * diff, axis=1, keepdims=True)          # (TB, 1)

        # Partial (un-normalized) sum for this batch tile, written lane-dense
        # (splat to the full (8,128) block -> unmasked vst; host reads [0,0]).
        part = jnp.sum(l1_rows + l2_rows, axis=0, keepdims=True)       # (1, 1)
        out_ref[...] = jnp.broadcast_to(part, out_ref.shape)

    return kernel


def _pick_tile_b(B, Cp, D, budget_bytes=24 * 1024 * 1024):
    """Largest batch tile (multiple of 16) that divides B, fits a conservative
    VMEM working-set budget, and (when possible) leaves >= 2 grid blocks so the
    'parallel' axis can shard across v7x's two TensorCores."""
    def fits(tb):
        streamed = 2 * (tb * Cp * 4 + tb * D * 2 + 2 * tb * 4)   # double-buffered
        temps = 3 * tb * Cp * 4                                  # f32 temporaries
        return streamed + temps <= budget_bytes

    cands = [tb for tb in (2048, 1024, 512, 256, 128, 64, 32, 16)
             if B % tb == 0 and fits(tb)]
    if B >= 32:
        for tb in cands:
            if 2 * tb <= B:          # guarantee nb >= 2 (megacore on v7x)
                return tb
    return cands[0] if cands else B


def _prototype_spec(D, Cp):
    """Constant-index prototype block: single-buffered if the API allows it."""
    if hasattr(pl, "Buffered"):
        try:
            return pl.BlockSpec((D, Cp), lambda i: (0, 0),
                                pipeline_mode=pl.Buffered(1))
        except TypeError:
            pass
    return pl.BlockSpec((D, Cp), lambda i: (0, 0))


def ncod_loss_core(logits, labels, phi_x_i, h_c_bar_T_padded, u_batch):
    """Runs the Pallas kernel; returns a scalar f32 loss.

    labels: (B,) integer class ids (NCOD is used with strict one-hot targets).
    h_c_bar_T_padded: (D, Cp) bf16 cached normalized prototypes, Cp % 128 == 0.
    """
    B, C = logits.shape
    D = phi_x_i.shape[1]
    Cp = h_c_bar_T_padded.shape[1]
    assert Cp % 128 == 0 and Cp >= C

    logits = logits.astype(jnp.float32)
    if Cp > C:
        logits = jnp.pad(logits, ((0, 0), (0, Cp - C)), constant_values=NEG_BIG)
    lbl = labels.astype(jnp.int32).reshape(B, 1)
    phi = phi_x_i.astype(jnp.bfloat16)            # halve dominant HBM traffic
    hcT = h_c_bar_T_padded.astype(jnp.bfloat16)   # no-op if already cached bf16
    u = u_batch.astype(jnp.float32).reshape(B, 1)

    TB = _pick_tile_b(B, Cp, D)
    nb = B // TB

    # VMEM budget: double-buffered per-batch blocks, single-buffered prototypes,
    # output double-buffer, plus headroom for f32 temporaries.  Cap at 40 MiB so
    # v7x (64 MiB/TC) keeps compiler headroom.
    block_bytes = TB * Cp * 4 + TB * D * 2 + 2 * TB * 4
    vmem_limit = int(min(40 * 1024 * 1024,
                         max(16 * 1024 * 1024,
                             2 * block_bytes + D * Cp * 2
                             + 4 * TB * Cp * 4 + 2 * 8 * 128 * 4)))

    cost = pl.CostEstimate(
        flops=2 * B * D * Cp + 16 * B * Cp,
        transcendentals=B * Cp + 3 * B,
        bytes_accessed=B * Cp * 4 + B * D * 2 + D * Cp * 2 + 2 * B * 4
                       + nb * 8 * 128 * 4,
    )

    out = pl.pallas_call(
        _make_ncod_kernel(C),
        out_shape=jax.ShapeDtypeStruct((nb * 8, 128), jnp.float32),
        grid=(nb,),
        in_specs=[
            pl.BlockSpec((TB, Cp), lambda i: (i, 0)),   # logits (padded)
            pl.BlockSpec((TB, 1), lambda i: (i, 0)),    # int32 labels
            pl.BlockSpec((TB, D), lambda i: (i, 0)),    # bf16 features
            _prototype_spec(D, Cp),                     # VMEM-resident prototypes
            pl.BlockSpec((TB, 1), lambda i: (i, 0)),    # u
        ],
        out_specs=pl.BlockSpec((8, 128), lambda i: (i, 0)),
        compiler_params=pltpu.CompilerParams(
            dimension_semantics=("parallel",),          # shards blocks across TCs
            vmem_limit_bytes=vmem_limit),
        cost_estimate=cost,
    )(logits, lbl, phi, hcT, u)

    partials = out.reshape(nb, 8, 128)[:, 0, 0]         # one scalar per block
    return jnp.sum(partials) / B


class NCODLossJax:
    """JAX/Pallas port of NCODLoss (forward only)."""

    def __init__(self, labels, n_samples, num_classes,
                 ratio_consistency=0, ratio_balance=0, key=None):
        self.num_classes = num_classes
        self.padded_classes = max(128, ((num_classes + 127) // 128) * 128)
        self.n_samples = n_samples
        self.ratio_consistency = ratio_consistency
        self.ratio_balance = ratio_balance
        if key is None:
            key = jax.random.PRNGKey(0)
        ku, kp, kc = jax.random.split(key, 3)
        # u ~ Normal(1e-8, 1e-9), shape (n_samples, 1)
        self.u = 1e-8 + 1e-9 * jax.random.normal(ku, (n_samples, 1), jnp.float32)
        self.labels = np.asarray(labels)
        self.bins = [np.where(self.labels == i)[0] for i in range(num_classes)]
        self.beginning = True
        # torch.rand -> U(0,1)
        self.prev_phi_x_i = jax.random.uniform(kp, (n_samples, 512), jnp.float32)
        self.phi_c = jax.random.uniform(kc, (num_classes, 512), jnp.float32)
        # normalized + transposed + lane-padded prototypes cached for the kernel
        self.h_c_bar_T = self._normalize_prototypes(self.phi_c, self.padded_classes)

    @staticmethod
    def _normalize_prototypes(phi_c, padded_classes):
        n = jnp.linalg.norm(phi_c, axis=1, keepdims=True)
        h_c = phi_c / jnp.maximum(n, EPS)
        hcT = jnp.transpose(h_c).astype(jnp.bfloat16)        # (512, C)
        pad = padded_classes - hcT.shape[1]
        if pad > 0:
            hcT = jnp.pad(hcT, ((0, 0), (0, pad)))           # zero lanes
        return hcT

    def __call__(self, index, logits, y_onehot, phi_x_i, flag=0, epoch=0):
        u_batch = self.u[index]                               # (B, 1)

        # per-class prototype refresh (rare parameter-setup glue; bins static).
        # phi_c only changes here, so normalization/transpose/pad is cached too.
        if flag == 0 and self.beginning:
            percent = math.ceil(50 - 50 / 5 * epoch + 50)
            phi_c = self.phi_c
            for i, idx in enumerate(self.bins):
                class_u = self.u[idx, 0]                                # (n_i,)
                bottomK = int(len(idx) / 100 * percent)
                order = jnp.argsort(class_u)[:bottomK]                  # k smallest u
                sel = self.prev_phi_x_i[idx][order]                     # (k, 512)
                phi_c = phi_c.at[i].set(jnp.mean(sel, axis=0))
            self.phi_c = phi_c
            self.h_c_bar_T = self._normalize_prototypes(phi_c, self.padded_classes)

        # kernel consumes int labels (NCOD targets are strict one-hot), which
        # avoids streaming a (B, C) f32 one-hot tensor through HBM.
        labels = jnp.argmax(y_onehot, axis=1)
        loss = ncod_loss_core(logits, labels, phi_x_i, self.h_c_bar_T, u_batch)

        # state update: self.prev_phi_x_i[index] = phi_x_i.detach()
        self.prev_phi_x_i = self.prev_phi_x_i.at[index].set(phi_x_i)

        if self.ratio_balance > 0:
            # TODO(synk): ratio_balance KL term not fused into the kernel (module default is 0).
            pass
        return loss


def ncod_ref(logits, y_onehot, phi_x_i, phi_c, u_batch):
    """Plain-JAX (f32) reference of the original NCOD forward math."""
    eps = 1e-4
    h_c = phi_c / jnp.maximum(jnp.linalg.norm(phi_c, axis=1, keepdims=True), eps)
    h_i = phi_x_i / jnp.maximum(jnp.linalg.norm(phi_x_i, axis=1, keepdims=True), eps)
    y_bar = h_i @ h_c.T
    y_bar = y_bar * y_onehot
    y_bar = y_bar * (y_bar > 0.0).astype(jnp.float32)
    u_y = u_batch * y_onehot
    sm = jax.nn.softmax(logits, axis=1)
    fxs = jnp.clip(sm + u_y, eps, 1.0)
    L1 = jnp.mean(-jnp.sum(y_bar * jnp.log(fxs), axis=1))
    y_hat = jax.nn.one_hot(jnp.argmax(logits, axis=1), logits.shape[1],
                           dtype=jnp.float32)
    L2 = jnp.sum((y_hat + u_y - y_onehot) ** 2) / logits.shape[0]
    return L1 + L2


if __name__ == "__main__":
    n_samples, num_classes, B, D = 64, 8, 16, 512

    key = jax.random.PRNGKey(0)
    k_mod, k_idx, k_logit, k_phi = jax.random.split(key, 4)

    labels = np.arange(n_samples) % num_classes
    module = NCODLossJax(labels, n_samples, num_classes, key=k_mod)

    index = jax.random.permutation(k_idx, n_samples)[:B]
    logits = jax.random.normal(k_logit, (B, num_classes), jnp.float32)
    y_onehot = jax.nn.one_hot(jnp.asarray(labels)[index], num_classes,
                              dtype=jnp.float32)
    phi_x_i = jax.random.normal(k_phi, (B, D), jnp.float32)

    loss = module(index, logits, y_onehot, phi_x_i, flag=0, epoch=0)
    loss = jax.block_until_ready(loss)

    # verify against the f32 reference using the same (post-update) phi_c;
    # kernel uses bf16 features/prototypes, so tolerance-based check.
    ref = ncod_ref(logits, y_onehot, phi_x_i, module.phi_c, module.u[index])
    ref = jax.block_until_ready(ref)
    assert np.isfinite(float(loss))
    np.testing.assert_allclose(float(loss), float(ref), rtol=2e-3, atol=2e-3)

    print("KERNEL_OK")
</pallas_src>

<mosaic_0001>
module attributes {stable_mosaic.version = 11 : i64} {
  func.func @kernel(%arg0: i32, %arg1: memref<16x128xf32, #tpu.memory_space<vmem>>, %arg2: memref<16x1xi32, #tpu.memory_space<vmem>>, %arg3: memref<16x512xbf16, #tpu.memory_space<vmem>>, %arg4: memref<512x128xbf16, #tpu.memory_space<vmem>>, %arg5: memref<16x1xf32, #tpu.memory_space<vmem>>, %arg6: memref<8x128xf32, #tpu.memory_space<vmem>>) attributes {dimension_semantics = [#tpu.dimension_semantics<parallel>], iteration_bounds = array<i64: 1>, scalar_prefetch = 0 : i64, scratch_operands = 0 : i64, tpu.core_type = #tpu.core_type<tc>, window_params = [{transform_indices = @transform_0, window_bounds = array<i64: 16, 128>}, {transform_indices = @transform_1, window_bounds = array<i64: 16, 1>}, {transform_indices = @transform_2, window_bounds = array<i64: 16, 512>}, {pipeline_mode = #tpu.pipeline_mode<synchronous>, transform_indices = @transform_3, window_bounds = array<i64: 512, 128>}, {transform_indices = @transform_4, window_bounds = array<i64: 16, 1>}, {transform_indices = @transform_5, window_bounds = array<i64: 8, 128>}]} {
    %c0 = arith.constant 0 : index
    %c0_0 = arith.constant 0 : index
    %0 = vector.load %arg1[%c0, %c0_0] : memref<16x128xf32, #tpu.memory_space<vmem>>, vector<16x128xf32>
    %c0_1 = arith.constant 0 : index
    %c0_2 = arith.constant 0 : index
    %1 = vector.load %arg2[%c0_1, %c0_2] : memref<16x1xi32, #tpu.memory_space<vmem>>, vector<16x1xi32>
    %c0_3 = arith.constant 0 : index
    %c0_4 = arith.constant 0 : index
    %2 = vector.load %arg5[%c0_3, %c0_4] : memref<16x1xf32, #tpu.memory_space<vmem>>, vector<16x1xf32>
    %3 = tpu.iota {dimensions = array<i32: 1>} : vector<16x128xi32>
    %4 = vector.broadcast %1 : vector<16x1xi32> to vector<16x128xi32>
    %5 = arith.cmpi eq, %3, %4 : vector<16x128xi32>
    %6 = arith.extui %5 : vector<16x128xi1> to vector<16x128xi32>
    %7 = arith.sitofp %6 : vector<16x128xi32> to vector<16x128xf32>
    %c0_5 = arith.constant 0 : index
    %c0_6 = arith.constant 0 : index
    %8 = vector.load %arg3[%c0_5, %c0_6] : memref<16x512xbf16, #tpu.memory_space<vmem>>, vector<16x512xbf16>
    %c0_7 = arith.constant 0 : index
    %c0_8 = arith.constant 0 : index
    %9 = vector.load %arg4[%c0_7, %c0_8] : memref<512x128xbf16, #tpu.memory_space<vmem>>, vector<512x128xbf16>
    %cst = arith.constant dense<0.000000e+00> : vector<16x128xf32>
    %10 = tpu.matmul %8, %9, %cst {dimension_numbers = #tpu.dot_dimension_numbers<[1], [0], [0], [1], [0, 0, 1, 1], [], []>} : vector<16x512xbf16>, vector<512x128xbf16>, vector<16x128xf32> -> vector<16x128xf32>
    %11 = arith.extf %8 : vector<16x512xbf16> to vector<16x512xf32>
    %12 = arith.mulf %11, %11 : vector<16x512xf32>
    %cst_9 = arith.constant dense<0.000000e+00> : vector<16xf32>
    %13 = vector.multi_reduction <add>, %12, %cst_9 [1] : vector<16x512xf32> to vector<16xf32>
    %14 = vector.shape_cast %13 : vector<16xf32> to vector<16x1xf32>
    %cst_10 = arith.constant 9.99999993E-9 : f32
    %15 = vector.broadcast %cst_10 : f32 to vector<16x1xf32>
    %16 = arith.maximumf %14, %15 : vector<16x1xf32>
    %17 = math.rsqrt %16 : vector<16x1xf32>
    %18 = arith.mulf %10, %7 : vector<16x128xf32>
    %cst_11 = arith.constant dense<0.000000e+00> : vector<16xf32>
    %19 = vector.multi_reduction <add>, %18, %cst_11 [1] : vector<16x128xf32> to vector<16xf32>
    %20 = vector.shape_cast %19 : vector<16xf32> to vector<16x1xf32>
    %21 = arith.mulf %20, %17 : vector<16x1xf32>
    %cst_12 = arith.constant 0.000000e+00 : f32
    %22 = vector.broadcast %cst_12 : f32 to vector<16x1xf32>
    %23 = arith.maximumf %21, %22 : vector<16x1xf32>
    %cst_13 = arith.constant dense<0xFF800000> : vector<16xf32>
    %24 = vector.multi_reduction <maximumf>, %0, %cst_13 [1] : vector<16x128xf32> to vector<16xf32>
    %25 = vector.shape_cast %24 : vector<16xf32> to vector<16x1xf32>
    %26 = vector.broadcast %25 : vector<16x1xf32> to vector<16x128xf32>
    %27 = arith.subf %0, %26 : vector<16x128xf32>
    %28 = math.exp %27 : vector<16x128xf32>
    %cst_14 = arith.constant dense<0.000000e+00> : vector<16xf32>
    %29 = vector.multi_reduction <add>, %28, %cst_14 [1] : vector<16x128xf32> to vector<16xf32>
    %30 = vector.shape_cast %29 : vector<16xf32> to vector<16x1xf32>
    %31 = arith.mulf %28, %7 : vector<16x128xf32>
    %cst_15 = arith.constant dense<0.000000e+00> : vector<16xf32>
    %32 = vector.multi_reduction <add>, %31, %cst_15 [1] : vector<16x128xf32> to vector<16xf32>
    %33 = vector.shape_cast %32 : vector<16xf32> to vector<16x1xf32>
    %34 = arith.divf %33, %30 : vector<16x1xf32>
    %35 = arith.addf %34, %2 : vector<16x1xf32>
    %cst_16 = arith.constant 9.99999974E-5 : f32
    %cst_17 = arith.constant 1.000000e+00 : f32
    %36 = vector.broadcast %cst_16 : f32 to vector<16x1xf32>
    %37 = arith.maximumf %36, %35 : vector<16x1xf32>
    %38 = vector.broadcast %cst_17 : f32 to vector<16x1xf32>
    %39 = arith.minimumf %38, %37 : vector<16x1xf32>
    %cst_18 = arith.constant 0.000000e+00 : f32
    %40 = vector.broadcast %cst_18 : f32 to vector<16x1xf32>
    %41 = arith.subf %40, %23 : vector<16x1xf32>
    %42 = math.log %39 : vector<16x1xf32>
    %43 = arith.mulf %41, %42 : vector<16x1xf32>
    %44 = vector.broadcast %25 : vector<16x1xf32> to vector<16x128xf32>
    %45 = arith.cmpf oeq, %0, %44 : vector<16x128xf32>
    %c8_i32 = arith.constant 8 : i32
    %46 = vector.broadcast %c8_i32 : i32 to vector<16x128xi32>
    %47 = arith.cmpi slt, %3, %46 : vector<16x128xi32>
    %48 = arith.andi %45, %47 : vector<16x128xi1>
    %c128_i32 = arith.constant 128 : i32
    %49 = vector.broadcast %c128_i32 : i32 to vector<16x128xi32>
    %50 = arith.select %48, %3, %49 : vector<16x128xi1>, vector<16x128xi32>
    %cst_19 = arith.constant dense<2147483647> : vector<16xi32>
    %51 = vector.multi_reduction <minsi>, %50, %cst_19 [1] : vector<16x128xi32> to vector<16xi32>
    %52 = vector.shape_cast %51 : vector<16xi32> to vector<16x1xi32>
    %53 = vector.broadcast %52 : vector<16x1xi32> to vector<16x128xi32>
    %54 = arith.cmpi eq, %3, %53 : vector<16x128xi32>
    %55 = arith.extui %54 : vector<16x128xi1> to vector<16x128xi32>
    %56 = arith.sitofp %55 : vector<16x128xi32> to vector<16x128xf32>
    %57 = vector.broadcast %2 : vector<16x1xf32> to vector<16x128xf32>
    %58 = arith.mulf %57, %7 : vector<16x128xf32>
    %59 = arith.addf %56, %58 : vector<16x128xf32>
    %60 = arith.subf %59, %7 : vector<16x128xf32>
    %61 = arith.mulf %60, %60 : vector<16x128xf32>
    %cst_20 = arith.constant dense<0.000000e+00> : vector<16xf32>
    %62 = vector.multi_reduction <add>, %61, %cst_20 [1] : vector<16x128xf32> to vector<16xf32>
    %63 = vector.shape_cast %62 : vector<16xf32> to vector<16x1xf32>
    %64 = arith.addf %43, %63 : vector<16x1xf32>
    %cst_21 = arith.constant dense<0.000000e+00> : vector<1xf32>
    %65 = vector.multi_reduction <add>, %64, %cst_21 [0] : vector<16x1xf32> to vector<1xf32>
    %66 = vector.shape_cast %65 : vector<1xf32> to vector<1x1xf32>
    %67 = vector.shape_cast %66 : vector<1x1xf32> to vector<1x1xf32>
    %68 = vector.broadcast %67 : vector<1x1xf32> to vector<8x128xf32>
    %c0_22 = arith.constant 0 : index
    %c0_23 = arith.constant 0 : index
    %69 = vector.load %arg6[%c0_22, %c0_23] : memref<8x128xf32, #tpu.memory_space<vmem>>, vector<8x128xf32>
    tpu.vector_store %arg6[%c0_22, %c0_23], %68 {strides = array<i32>} : memref<8x128xf32, #tpu.memory_space<vmem>>, vector<8x128xf32>,
    return
  }
  func.func @transform_0(%arg0: i32) -> (i32, i32) {
    %c0_i32 = arith.constant 0 : i32
    %c0_i32_0 = arith.constant 0 : i32
    return %arg0, %c0_i32 : i32, i32
  }
  func.func @transform_1(%arg0: i32) -> (i32, i32) {
    %c0_i32 = arith.constant 0 : i32
    %c0_i32_0 = arith.constant 0 : i32
    return %arg0, %c0_i32 : i32, i32
  }
  func.func @transform_2(%arg0: i32) -> (i32, i32) {
    %c0_i32 = arith.constant 0 : i32
    %c0_i32_0 = arith.constant 0 : i32
    return %arg0, %c0_i32 : i32, i32
  }
  func.func @transform_3(%arg0: i32) -> (i32, i32) {
    %c0_i32 = arith.constant 0 : i32
    %c0_i32_0 = arith.constant 0 : i32
    %c0_i32_1 = arith.constant 0 : i32
    return %c0_i32, %c0_i32_0 : i32, i32
  }
  func.func @transform_4(%arg0: i32) -> (i32, i32) {
    %c0_i32 = arith.constant 0 : i32
    %c0_i32_0 = arith.constant 0 : i32
    return %arg0, %c0_i32 : i32, i32
  }
  func.func @transform_5(%arg0: i32) -> (i32, i32) {
    %c0_i32 = arith.constant 0 : i32
    %c0_i32_0 = arith.constant 0 : i32
    return %arg0, %c0_i32 : i32, i32
  }
}

</mosaic_0001>

<bundles_post_ra>
// kernel: tpu_custom_call.1
= control target key start
LH: loop header
LB: loop body
LE: loop exit
PB: predicated region body
PF: predicated region fallthrough
CT: control target
= control target key end

     0   :  { %10 = vsyncpa [#allocation3], 0  ;;  %s951_s0 = inlined_call_operand.hbm [shape: f32[16,128], index: 0, kind: input, shape index: {}]   ;;  %s952_s1 = inlined_call_operand.vmem [shape: s32[16,1], index: 1, kind: input, shape index: {}]   ;;  %s953_s2 = inlined_call_operand.vmem [shape: bf16[16,512], index: 2, kind: input, shape index: {}]   ;;  %s954_s3 = inlined_call_operand.hbm [shape: bf16[512,128], index: 3, kind: input, shape index: {}]   ;;  %s955_s4 = inlined_call_operand.vmem [shape: f32[16,1], index: 4, kind: input, shape index: {}]   ;;  %s956_s5 = inlined_call_operand.hbm [shape: f32[8,128], index: 5, kind: output, shape index: {}]  }
   0x1   :  { %11 = vsyncpa [#allocation6], 0 }
   0x2   :  { %12 = vsyncpa [#allocation4], 0  ;;  %s820_s18 = smov [#allocation2]  }
   0x3   :  { %s18_s19 = sshll.u32 %s820_s18, 4  ;;  %s19_s19 = int_to_ptr.vmem [resolvable:$true] %s18_s19 }
   0x4   :  { %s762_s20 = scalar_lea.vmem %s19_s19, 256  ;;  %p767_p1 = scmp.lt.s32.totalorder %s19_s19, %s19_s19 }
   0x5   :  { %p763_p0 = scmp.ne.s32.totalorder %s19_s19, %s762_s20  ;;  %p768_p2 = scmp.lt.s32.totalorder %s762_s20, %s762_s20 }
   0x7   :  { %p769_p3 = por %p768_p2, %p767_p1 }
   0x9   :  { %p770_p4 = pnand %p769_p3, %p763_p0 }
   0xb   :  { %773 = shalt.err (!%p770_p4)
}
   0xc   :  { %s821_s21 = smov 128   ;;  %s822_s22 = smov 8  }
   0xd   :  { %24 = dma.hbm_to_vmem [thread:$0]  %s951_s0, 256, %s19_s19, [#allocation3], %s821_s21, %s821_s21, %s822_s22  }
   0xe   :  { %s823_s25 = smov [#allocation5]  }
   0xf   :  { %s34_s26 = sshll.u32 %s823_s25, 4  ;;  %s35_s26 = int_to_ptr.vmem [resolvable:$true] %s34_s26 }
  0x10   :  { %s782_s27 = scalar_lea.vmem %s35_s26, 4096  ;;  %p787_p6 = scmp.lt.s32.totalorder %s35_s26, %s35_s26 }
  0x11   :  { %p783_p5 = scmp.ne.s32.totalorder %s35_s26, %s782_s27  ;;  %p788_p7 = scmp.lt.s32.totalorder %s782_s27, %s782_s27 }
  0x13   :  { %p789_p8 = por %p788_p7, %p787_p6 }
  0x15   :  { %p790_p9 = pnand %p789_p8, %p783_p5 }
  0x17   :  { %793 = shalt.err (!%p790_p9)
}
  0x18   :  { %s824_s28 = smov 64   ;;  %s825_s29 = smov 4  }
  0x19   :  { %40 = dma.hbm_to_vmem [thread:$0]  %s954_s3, 4096, %s35_s26, [#allocation6], %s824_s28, %s824_s28, %s825_s29  }
  0x1a   :  { %814 = dma.done.wait [#allocation3], 256  }
  0x1b   :  { %815 = vsyncadd [#allocation3], 4294967040 }
  0x1c   :  { %816 = dma.done.wait [#allocation6], 4096  }
  0x1d   :  { %817 = vsyncadd [#allocation6], 4294963200  ;;  %v826_v0 = vmov 0   ;;  %v865_v1 = vld [vmem:[#allocation2] sm:$0xff]  ;;  %v867_v2 = vld [vmem:[#allocation2 + $0x8] sm:$0xff]  ;;  %v56_v44 = vlaneseq  ;;  %vm575_vm11 = vcmask 7168  }
  0x1e   :  { %700 = vset.pattern.permute.xlu0 %v826_v0  ;;  %701 = vset.pattern.permute.xlu1 %v826_v0  ;;  %v702_v3 = vld [vmem:[#allocation5 + $0x78] sm:$0xff]   ;;  %v706_v7 = vld [vmem:[#allocation5 + $0x70] sm:$0xff]   ;;  %v710_v11 = vld [vmem:[#allocation5 + $0x68] sm:$0xff]  }
  0x1f   :  { %472 = vmax.xlane.f32.xlu0 %v865_v1  ;;  %v703_v4 = vld [vmem:[#allocation5 + $0xf8] sm:$0xff]   ;;  %647 = vmatprep.subr.bf16.mxu0 %v702_v3  ;;  %v707_v8 = vld [vmem:[#allocation5 + $0xf0] sm:$0xff]   ;;  %v711_v12 = vld [vmem:[#allocation5 + $0xe8] sm:$0xff]   ;;  %v898_v45 = vand.u32 127, %v56_v44 }
  0x20   :  { %v704_v5 = vld [vmem:[#allocation5 + $0x38] sm:$0xff]   ;;  %669 = vmatprep.subr.bf16.mxu1 %v703_v4  ;;  %v708_v9 = vld [vmem:[#allocation5 + $0x30] sm:$0xff]   ;;  %v712_v13 = vld [vmem:[#allocation5 + $0x28] sm:$0xff]  }
  0x21   :  { %v705_v6 = vld [vmem:[#allocation5 + $0xb8] sm:$0xff]   ;;  %648 = vmatpush3.bf16.msra.mxu0 %v704_v5  ;;  %v709_v10 = vld [vmem:[#allocation5 + $0xb0] sm:$0xff]   ;;  %v713_v14 = vld [vmem:[#allocation5 + $0xa8] sm:$0xff]   ;;  %vm512_vm0 = vcmp.lt.s32.totalorder %v898_v45, 8 }
  0x22   :  { %670 = vmatpush3.bf16.msra.mxu1 %v705_v6  ;;  %649 = vmatprep.subr.bf16.mxu0 %v706_v7  ;;  %v714_v15 = vld [vmem:[#allocation5 + $0x60] sm:$0xff]   ;;  %v718_v19 = vld [vmem:[#allocation5 + $0x58] sm:$0xff]   ;;  %v722_v23 = vld [vmem:[#allocation5 + $0x50] sm:$0xff]  }
  0x23   :  { %474 = vmax.xlane.f32.xlu0 %v867_v2  ;;  %671 = vmatprep.subr.bf16.mxu1 %v707_v8  ;;  %v715_v16 = vld [vmem:[#allocation5 + $0xe0] sm:$0xff]   ;;  %v719_v20 = vld [vmem:[#allocation5 + $0xd8] sm:$0xff]   ;;  %v52_v24 = vld [vmem:[%s952_s1] sm:$0xff] }
  0x24   :  { %v716_v17 = vld [vmem:[#allocation5 + $0x20] sm:$0xff]   ;;  %v720_v21 = vld [vmem:[#allocation5 + $0x18] sm:$0xff]   ;;  %v723_v25 = vld [vmem:[#allocation5 + $0xd0] sm:$0xff]  }
  0x25   :  { %650 = vmatpush3.bf16.msra.mxu0 %v708_v9  ;;  %v717_v18 = vld [vmem:[#allocation5 + $0xa0] sm:$0xff]   ;;  %v721_v22 = vld [vmem:[#allocation5 + $0x98] sm:$0xff]   ;;  %v724_v26 = vld [vmem:[#allocation5 + $0x10] sm:$0xff]  }
  0x26   :  { %672 = vmatpush3.bf16.msra.mxu1 %v709_v10  ;;  %651 = vmatprep.subr.bf16.mxu0 %v710_v11  ;;  %v725_v27 = vld [vmem:[#allocation5 + $0x90] sm:$0xff]   ;;  %v726_v28 = vld [vmem:[#allocation5 + $0x48] sm:$0xff]   ;;  %v730_v32 = vld [vmem:[#allocation5 + $0x40] sm:$0xff]  }
  0x27   :  { %673 = vmatprep.subr.bf16.mxu1 %v711_v12  ;;  %v727_v29 = vld [vmem:[#allocation5 + $0xc8] sm:$0xff]   ;;  %v731_v33 = vld [vmem:[#allocation5 + $0xc0] sm:$0xff]   ;;  %v70_v36 = vld [vmem:[%s953_s2] sm:$0xff] }
  0x28   :  { %v728_v30 = vld [vmem:[#allocation5 + $0x8] sm:$0xff]   ;;  %v732_v34 = vld [vmem:[#allocation5] sm:$0xff]   ;;  %v885_v38 = vld [vmem:[%s953_s2 + $0x8] sm:$0xff]  ;;  %v432_v0 = vunpack.c.l.bf16 %v70_v36  ;;  %v433_v3 = vunpack.c.h.bf16 %v70_v36 }
  0x29   :  { %652 = vmatpush3.bf16.msra.mxu0 %v712_v13  ;;  %v729_v31 = vld [vmem:[#allocation5 + $0x88] sm:$0xff]   ;;  %v733_v35 = vld [vmem:[#allocation5 + $0x80] sm:$0xff]   ;;  %v53_v54 = vld [vmem:[%s952_s1 + $0x8] sm:$0xff]  ;;  %v434_v6 = vunpack.c.l.bf16 %v885_v38 }
  0x2a   :  { %674 = vmatpush3.bf16.msra.mxu1 %v713_v14  ;;  %653 = vmatprep.subr.bf16.mxu0 %v714_v15  ;;  %v880_v37 = vld [vmem:[%s953_s2 + $0x10] sm:$0xff]  ;;  %v891_v40 = vld [vmem:[%s953_s2 + $0x18] sm:$0xff]  ;;  %v440_v7 = vmul.f32 %v432_v0, %v432_v0  ;;  %v441_v8 = vmul.f32 %v433_v3, %v433_v3  ;;  %v55_v44 = vld [vmem:[%s955_s4 + $0x8] sm:$0xff] }
  0x2b   :  { %675 = vmatprep.subr.bf16.mxu1 %v715_v16  ;;  %v610_v39 = vcombine.high %v70_v36, %v880_v37  ;;  %v609_v41 = vcombine.low %v70_v36, %v880_v37  ;;  %v612_v42 = vcombine.high %v885_v38, %v891_v40  ;;  %v611_v43 = vcombine.low %v885_v38, %v891_v40  ;;  %v932_v36 = vld [vmem:[%s955_s4] sm:$0xff]  ;;  %s828_s4 = smov [#allocation7]  }
  0x2c   :  { %v436_v9 = vunpack.c.l.bf16 %v880_v37  ;;  %v437_v10 = vunpack.c.h.bf16 %v880_v37  ;;  %v827_v16 = vmov 0.0   ;;  %s597_s19 = sshll.u32 %s828_s4, 4  ;;  %s598_s19 = int_to_ptr.vmem [resolvable:$true] %s597_s19 }
  0x2d   :  { %654 = vmatpush3.bf16.msra.mxu0 %v716_v17  ;;  %382 = vmatprep.mubr.bf16.mxu0 %v610_v39  ;;  %s794_s20 = scalar_lea.vmem %s598_s19, 128  ;;  %p799_p11 = scmp.lt.s32.totalorder %s598_s19, %s598_s19 }
  0x2e   :  { %676 = vmatpush3.bf16.msra.mxu1 %v717_v18  ;;  %655 = vmatprep.subr.bf16.mxu0 %v718_v19  ;;  %v435_v18 = vunpack.c.h.bf16 %v885_v38  ;;  %v442_v19 = vmul.f32 %v434_v6, %v434_v6  ;;  %p795_p10 = scmp.ne.s32.totalorder %s598_s19, %s794_s20  ;;  %p800_p12 = scmp.lt.s32.totalorder %s794_s20, %s794_s20 }
  0x2f   :  { %677 = vmatprep.subr.bf16.mxu1 %v719_v20  ;;  %423 = vmatprep.mubr.bf16.mxu1 %v612_v42  ;;  %v448_v20 = vadd.f32 %v441_v8, %v440_v7 }
  0x30   :  { %p801_p13 = por %p800_p12, %p799_p11 }
  0x31   :  { %656 = vmatpush3.bf16.msra.mxu0 %v720_v21  ;;  %v438_v21 = vunpack.c.l.bf16 %v891_v40 }
  0x32   :  { %678 = vmatpush3.bf16.msra.mxu1 %v721_v22  ;;  %657 = vmatprep.subr.bf16.mxu0 %v722_v23  ;;  %v444_v22 = vmul.f32 %v436_v9, %v436_v9  ;;  %v445_v23 = vmul.f32 %v437_v10, %v437_v10  ;;  %p802_p0 = pnand %p801_p13, %p795_p10 }
  0x33   :  { %679 = vmatprep.subr.bf16.mxu1 %v723_v25 }
  0x35   :  { %658 = vmatpush3.bf16.msra.mxu0 %v724_v26 }
  0x36   :  { %680 = vmatpush3.bf16.msra.mxu1 %v725_v27  ;;  %659 = vmatprep.subr.bf16.mxu0 %v726_v28  ;;  %v443_v28 = vmul.f32 %v435_v18, %v435_v18 }
  0x37   :  { %681 = vmatprep.subr.bf16.mxu1 %v727_v29  ;;  %v449_v29 = vadd.f32 %v448_v20, %v442_v19 }
  0x39   :  { %59 = vperm.xlu0 %700, %v52_v24   ;;  %660 = vmatpush3.bf16.msra.mxu0 %v728_v30  ;;  %v439_v30 = vunpack.c.h.bf16 %v891_v40  ;;  %v450_v37 = vadd.f32 %v449_v29, %v443_v28 }
  0x3a   :  { %682 = vmatpush3.bf16.msra.mxu1 %v729_v31  ;;  %661 = vmatprep.subr.bf16.mxu0 %v730_v32  ;;  %v446_v31 = vmul.f32 %v438_v21, %v438_v21  ;;  %v453_v32 = vadd.f32 %v445_v23, %v444_v22 }
  0x3b   :  { %683 = vmatprep.subr.bf16.mxu1 %v731_v33  ;;  %v447_v38 = vmul.f32 %v439_v30, %v439_v30 }
  0x3c   :  { %v454_v39 = vadd.f32 %v453_v32, %v446_v31 }
  0x3d   :  { %662 = vmatpush3.bf16.msra.mxu0 %v732_v34 }
  0x3e   :  { %684 = vmatpush3.bf16.msra.mxu1 %v733_v35 }
  0x40   :  { %383 = vmatmul.mubr.bf16.vlgmr.msra.gmra.mxu0 %v609_v41 }
  0x41   :  { %424 = vmatmul.mubr.bf16.vlgmr.msra.gmra.mxu1 %v611_v43 }
  0xa8   :  { %v473_v46 = vpop.xlane.xlu0 %472 }
  0xa9   :  { %vm510_vm1 = vcmp.eq.f32.partialorder %v865_v1, %v473_v46  ;;  %v476_v55 = vsub.f32 %v865_v1, %v473_v46  ;;  %v455_v46 = vadd.f32 %v454_v39, %v447_v38 }
  0xaa   :  { %vm513_vm2 = vmand %vm510_vm1, %vm512_vm0 }
  0xab   :  { %v515_v47 = vsel %vm513_vm2, %v898_v45, 128  ;;  %v478_v57 = vmul.f32 1.442695, %v476_v55 }
  0xac   :  { %v475_v48 = vpop.xlane.xlu0 %474  ;;  %v518_v49 = vshra.s32 %v515_v47, 16  ;;  %v517_v59 = vand.u32 65535, %v515_v47 }
  0xad   :  { %vm511_vm3 = vcmp.eq.f32.partialorder %v867_v2, %v475_v48  ;;  %v477_v56 = vsub.f32 %v867_v2, %v475_v48  ;;  %738 = vpow2.f32 %v478_v57 }
  0xae   :  { %vm514_vm4 = vmand %vm511_vm3, %vm512_vm0  ;;  %v520_v50 = vcvt.s32.f32 %v518_v49  ;;  %v519_v61 = vcvt.s32.f32 %v517_v59 }
  0xaf   :  { %v516_v51 = vsel %vm514_vm4, %v898_v45, 128  ;;  %v480_v58 = vmul.f32 1.442695, %v477_v56 }
  0xb0   :  { %521 = vmin.xlane.f32.xlu1 %v520_v50  ;;  %v532_v52 = vshra.s32 %v516_v51, 16  ;;  %v531_v62 = vand.u32 65535, %v516_v51 }
  0xb1   :  { %740 = vpow2.f32 %v480_v58 }
  0xb2   :  { %v534_v53 = vcvt.s32.f32 %v532_v52  ;;  %v533_v1 = vcvt.s32.f32 %v531_v62 }
  0xb4   :  { %535 = vmin.xlane.f32.xlu1 %v534_v53  ;;  %v60_v4 = vpop.permute.xlu0 %59 }
  0xb5   :  { %vm64_vm7 = vcmp.eq.s32.totalorder %v898_v45, %v60_v4 }
  0xb6   :  { %v921_v17 = vsel %vm64_vm7, 1.0, %v827_v16 }
  0xba   :  { %v739_v14 = vpop.eup %738 }
  0xbb   :  { %v486_v26 = vmul.f32 %v739_v14, %v921_v17 }
  0xbe   :  { %v741_v15 = vpop.eup %740 }
  0xc5   :  { %62 = vperm.xlu1 %701, %v53_v54  }
 0x100   :  { %v663_v11 = vpop.f32.mrf.mxu0 }
 0x101   :  { %v685_v13 = vpop.f32.mrf.mxu1 }
 0x102   :  { %v664_v24 = vpop.f32.mrf.mxu0 }
 0x103   :  { %v686_v25 = vpop.f32.mrf.mxu1  ;;  %v665_v41 = vadd.f32 %v664_v24, %v663_v11 }
 0x104   :  { %v666_v33 = vpop.f32.mrf.mxu0  ;;  %v687_v42 = vadd.f32 %v686_v25, %v685_v13 }
 0x105   :  { %v688_v34 = vpop.f32.mrf.mxu1 }
 0x106   :  { %v667_v43 = vpop.f32.mrf.mxu0  ;;  %v426_v47 = vadd.f32 %v687_v42, %v665_v41 }
 0x107   :  { %v689_v40 = vpop.f32.mrf.mxu1  ;;  %v668_v48 = vadd.f32 %v667_v43, %v666_v33 }
 0x108   :  { %v690_v49 = vadd.f32 %v689_v40, %v688_v34  ;;  %v462_v51 = vmul.f32 %v921_v17, %v426_v47 }
 0x139   :  { %v910_v60 = vpop.xlane.xlu1 %521 }
 0x13a   :  { %vm523_vm5 = vcmp.eq.f32.partialorder %v520_v50, %v910_v60  ;;  %v429_v50 = vadd.f32 %v690_v49, %v668_v48 }
 0x13b   :  { %v524_v63 = vsel %vm523_vm5, %v519_v61, inf }
 0x13c   :  { %525 = vmin.xlane.f32.xlu1 %v524_v63 }
 0x13d   :  { %v913_v5 = vpop.xlane.xlu1 %535 }
 0x13e   :  { %vm537_vm6 = vcmp.eq.f32.partialorder %v534_v53, %v913_v5  ;;  %v528_v53 = vcvt.f32.s32 %v910_v60  ;;  %v542_v56 = vcvt.f32.s32 %v913_v5 }
 0x13f   :  { %v538_v2 = vsel %vm537_vm6, %v533_v1, inf }
 0x140   :  { %539 = vmin.xlane.f32.xlu0 %v538_v2  ;;  %v529_v55 = vshll.u32 %v528_v53, 16  ;;  %v543_v62 = vshll.u32 %v542_v56, 16 }
 0x141   :  { %v63_v12 = vpop.permute.xlu1 %62 }
 0x142   :  { %vm65_vm8 = vcmp.eq.s32.totalorder %v898_v45, %v63_v12 }
 0x143   :  { %v608_v27 = vsel %vm65_vm8, 1.0, %v827_v16 }
 0x144   :  { %484 = vadd.xlane.f32.xlu0 %v741_v15  ;;  %v487_v35 = vmul.f32 %v741_v15, %v608_v27  ;;  %v463_v52 = vmul.f32 %v608_v27, %v429_v50 }
 0x148   :  { %488 = vadd.xlane.f32.xlu0 %v486_v26 }
 0x14c   :  { %490 = vadd.xlane.f32.xlu0 %v487_v35 }
 0x14d   :  { %553 = vperm.xlu1 %701, %v932_v36  }
 0x150   :  { %451 = vadd.xlane.f32.xlu0 %v450_v37 }
 0x151   :  { %558 = vperm.xlu1 %701, %v55_v44  }
 0x154   :  { %456 = vadd.xlane.f32.xlu0 %v455_v46 }
 0x158   :  { %464 = vadd.xlane.f32.xlu0 %v462_v51 }
 0x15c   :  { %466 = vadd.xlane.f32.xlu0 %v463_v52 }
 0x175   :  { %482 = vadd.xlane.f32.xlu1 %v739_v14 }
 0x1c5   :  { %v526_v54 = vpop.xlane.xlu1 %525 }
 0x1c6   :  { %v527_v57 = vcvt.f32.s32 %v526_v54 }
 0x1c8   :  { %v530_v58 = vadd.s32 %v529_v55, %v527_v57 }
 0x1c9   :  { %v554_v59 = vpop.permute.xlu1 %553  ;;  %v540_v61 = vpop.xlane.xlu0 %539 }
 0x1ca   :  { %vm545_vm9 = vcmp.eq.s32.totalorder %v898_v45, %v530_v58  ;;  %v561_v63 = vmul.f32 %v921_v17, %v554_v59  ;;  %v541_v0 = vcvt.f32.s32 %v540_v61 }
 0x1cb   :  { %v645_v3 = vsel %vm545_vm9, 1.0, %v827_v16 }
 0x1cc   :  { %v563_v4 = vadd.f32 %v645_v3, %v561_v63  ;;  %v544_v1 = vadd.s32 %v543_v62, %v541_v0 }
 0x1cd   :  { %v559_v2 = vpop.permute.xlu1 %558  ;;  %v485_v11 = vpop.xlane.xlu0 %484 }
 0x1ce   :  { %vm546_vm10 = vcmp.eq.s32.totalorder %v898_v45, %v544_v1  ;;  %v562_v60 = vmul.f32 %v608_v27, %v559_v2  ;;  %v565_v5 = vsub.f32 %v563_v4, %v921_v17 }
 0x1cf   :  { %v646_v6 = vsel %vm546_vm10, 1.0, %v827_v16 }
 0x1d0   :  { %v564_v7 = vadd.f32 %v646_v6, %v562_v60  ;;  %v567_v8 = vmul.f32 %v565_v5, %v565_v5 }
 0x1d1   :  { %v489_v13 = vpop.xlane.xlu0 %488 }
 0x1d2   :  { %569 = vadd.xlane.f32.xlu0 %v567_v8  ;;  %v566_v9 = vsub.f32 %v564_v7, %v608_v27 }
 0x1d4   :  { %v568_v10 = vmul.f32 %v566_v9, %v566_v9 }
 0x1d5   :  { %v491_v14 = vpop.xlane.xlu0 %490 }
 0x1d6   :  { %571 = vadd.xlane.f32.xlu0 %v568_v10 }
 0x1d9   :  { %v452_v18 = vpop.xlane.xlu0 %451 }
 0x1da   :  { %v458_v21 = vmax.f32 %v452_v18, 1e-08 }
 0x1dd   :  { %v457_v17 = vpop.xlane.xlu0 %456 }
 0x1de   :  { %v459_v23 = vmax.f32 %v457_v17, 1e-08 }
 0x1e1   :  { %v465_v28 = vpop.xlane.xlu0 %464 }
 0x1e5   :  { %v467_v31 = vpop.xlane.xlu0 %466 }
 0x1fe   :  { %v483_v12 = vpop.xlane.xlu1 %482 }
 0x1ff   :  { %742 = vrcp.f32 %v483_v12 }
 0x200   :  { %744 = vrcp.f32 %v485_v11 }
 0x201   :  { %746 = vrsqrt.f32 %v458_v21 }
 0x202   :  { %748 = vrsqrt.f32 %v459_v23 }
 0x20c   :  { %v743_v15 = vpop.eup %742 }
 0x20d   :  { %v745_v45 = vpop.eup %744  ;;  %v493_v19 = vmul.f32 %v743_v15, %v489_v13 }
 0x20e   :  { %v495_v20 = vmul.f32 %v745_v45, %v491_v14  ;;  %v747_v29 = vpop.eup %746 }
 0x20f   :  { %v496_v16 = vadd.f32 %v493_v19, %v932_v36  ;;  %v749_v30 = vpop.eup %748  ;;  %v468_v32 = vmul.f32 %v747_v29, %v465_v28 }
 0x210   :  { %v497_v22 = vadd.f32 %v495_v20, %v55_v44  ;;  %v469_v33 = vmul.f32 %v749_v30, %v467_v31 }
 0x211   :  { %v498_v24 = vmax.f32 %v496_v16, 0.0001  ;;  %v470_v34 = vmax.f32 %v468_v32, 0.0 }
 0x212   :  { %v499_v25 = vmax.f32 %v497_v22, 0.0001  ;;  %v471_v37 = vmax.f32 %v469_v33, 0.0 }
 0x213   :  { %v500_v26 = vmin.f32 %v498_v24, 1.0  ;;  %v502_v38 = vsub.f32 0.0, %v470_v34 }
 0x214   :  { %v501_v27 = vmin.f32 %v499_v25, 1.0  ;;  %v503_v41 = vsub.f32 0.0, %v471_v37 }
 0x215   :  { %750 = vlog2.f32 %v500_v26 }
 0x216   :  { %752 = vlog2.f32 %v501_v27 }
 0x222   :  { %v751_v35 = vpop.eup %750 }
 0x223   :  { %v753_v36 = vpop.eup %752  ;;  %v505_v39 = vmul.f32 0.6931472, %v751_v35 }
 0x224   :  { %v507_v42 = vmul.f32 0.6931472, %v753_v36 }
 0x225   :  { %v508_v40 = vmul.f32 %v505_v39, %v502_v38 }
 0x226   :  { %v509_v46 = vmul.f32 %v507_v42, %v503_v41 }
 0x25b   :  { %v570_v43 = vpop.xlane.xlu0 %569 }
 0x25c   :  { %v573_v44 = vadd.f32 %v570_v43, %v508_v40 }
 0x25e   :  { %v576_v49 = vsel %vm575_vm11, %v573_v44, 0.0 }
 0x25f   :  { %v572_v47 = vpop.xlane.xlu0 %571 }
 0x260   :  { %v574_v48 = vadd.f32 %v572_v47, %v509_v46 }
 0x262   :  { %v577_v50 = vsel %vm575_vm11, %v574_v48, 0.0 }
 0x263   :  { %v578_v51 = vadd.f32 %v577_v50, %v576_v49 }
 0x265   :  { %v579_v52 = vrot.slane %v578_v51, 4 }
 0x267   :  { %v580_v53 = vadd.f32 %v579_v52, %v578_v51 }
 0x269   :  { %v581_v54 = vrot.slane %v580_v53, 2 }
 0x26b   :  { %v582_v55 = vadd.f32 %v581_v54, %v580_v53 }
 0x26d   :  { %v583_v56 = vrot.slane %v582_v55, 1 }
 0x26f   :  { %v584_v57 = vadd.f32 %v583_v56, %v582_v55 }
 0x271   :  { %587 = vperm.xlu1 %701, %v584_v57  }
 0x2ec   :  { %v588_v58 = vpop.permute.xlu1 %587 }
 0x2ed   :  { %590 = vst [vmem:[#allocation7] sm:$0xff] %v588_v58 }
 0x2ee   :  { %805 = shalt.err (!%p802_p0)
}
 0x2ef   :  { %600 = dma.vmem_to_hbm [thread:$0]  %s598_s19, 128, %s956_s5, [#allocation4]  }
 0x2f0   :  { %818 = dma.done.wait [#allocation4], 128  }
 0x2f1   :  { %819 = vsyncadd [#allocation4], 4294967168 }
 0x2f2   :  { %604 = vsyncpa [#allocation3], 1 }
 0x2f3   :  { %605 = vsyncpa [#allocation6], 1 }
 0x2f4   :  { %606 = vsyncpa [#allocation4], 1 }

</bundles_post_ra>
